<compile_context>
chip_gen: v5e
topology: v5e:2x2
jax: 0.10.0
libtpu: 0.0.40
codegen_flags: <defaults>
</compile_context>

<pallas_src>
import jax
import jax.numpy as jnp
from jax.experimental import pallas as pl
from jax.experimental.pallas import tpu as pltpu

HIDDEN = 768          # BERT hidden size
FC1_OUT = 128
NUM_CLASSES = 2
OUT_PAD = 128         # lane-dense padded width of the fc2 output
BN_EPS = 1e-5


def head_kernel(x_ref, w1_ref, b1_ref, w2_ref, b2_ref, o_ref):
    """Fused fc1(+folded BN) -> ReLU -> fc2 (lane-padded) for one batch tile."""
    # In-kernel bf16 cast of the activation tile (x stays f32 in HBM; no
    # separate wrapper-side cast/pad round trip on the dominant stream).
    x = x_ref[...].astype(jnp.bfloat16)
    # fc1 with BatchNorm folded into W1/bias: bf16 operands, f32 accumulation.
    h = jnp.dot(x, w1_ref[...], preferred_element_type=jnp.float32)
    h = jnp.maximum(h + b1_ref[...], 0.0)                  # bias + ReLU (f32, VPU)
    # fc2 padded to 128 output lanes; real logits live in columns [:NUM_CLASSES].
    o = jnp.dot(h.astype(jnp.bfloat16), w2_ref[...],
                preferred_element_type=jnp.float32)
    # bf16 lane-dense store (halves output writeback traffic).
    o_ref[...] = (o + b2_ref[...]).astype(jnp.bfloat16)


def _round_up(x, m):
    return ((x + m - 1) // m) * m


def finetune_head(cls_feats, w1, b1, gamma, beta, running_mean, running_var,
                  w2, b2, *, block_m=512):
    """cls_feats: [B, 768] float32 (BERT CLS token features). Returns [B, 2] f32."""
    B = cls_feats.shape[0]

    # ---- trace-time folding / padding (tiny, fused by XLA) ------------------
    # Fold eval-mode BatchNorm1d into fc1: y = (x@W1 + b1)*scale + shift.
    scale = gamma / jnp.sqrt(running_var + BN_EPS)               # [128]
    shift = beta - running_mean * scale                          # [128]
    w1_folded = (w1 * scale[None, :]).astype(jnp.bfloat16)       # [768,128] bf16
    bias1 = (b1 * scale + shift).reshape(1, FC1_OUT)             # [1,128]  f32

    # Zero-pad fc2 so the output is a full 128-lane tile (unmasked stores).
    w2_pad = jnp.zeros((FC1_OUT, OUT_PAD), jnp.float32).at[:, :NUM_CLASSES].set(w2)
    w2_pad = w2_pad.astype(jnp.bfloat16)                         # [128,128] bf16
    b2_pad = jnp.zeros((1, OUT_PAD), jnp.float32).at[:, :NUM_CLASSES].set(
        b2.reshape(1, NUM_CLASSES))                              # [1,128]  f32

    # Batch tiling: tm a multiple of 16 (bf16 sublane packing) capped at
    # block_m; the ragged last tile is handled by Pallas' uneven-grid masking
    # (padded reads, masked writes), so there is NO jnp.pad pre-pass.
    if B >= 16:
        tm = min(block_m, (B // 16) * 16)
    else:
        tm = B                      # tiny batch: full-extent block is allowed
    grid_m = pl.cdiv(B, tm)
    # v7x has 2 TensorCores: keep >= 2 grid steps when there is enough work.
    if grid_m == 1 and B >= 32:
        tm = _round_up(pl.cdiv(B, 2), 16)
        grid_m = pl.cdiv(B, tm)

    out = pl.pallas_call(
        head_kernel,
        out_shape=jax.ShapeDtypeStruct((B, OUT_PAD), jnp.bfloat16),
        grid=(grid_m,),
        in_specs=[
            pl.BlockSpec((tm, HIDDEN), lambda i: (i, 0)),           # x batch tile (f32)
            pl.BlockSpec((HIDDEN, FC1_OUT), lambda i: (0, 0)),      # W1 (BN folded)
            pl.BlockSpec((1, FC1_OUT), lambda i: (0, 0)),           # fused bias1
            pl.BlockSpec((FC1_OUT, OUT_PAD), lambda i: (0, 0)),     # W2 (padded)
            pl.BlockSpec((1, OUT_PAD), lambda i: (0, 0)),           # b2 (padded)
        ],
        out_specs=pl.BlockSpec((tm, OUT_PAD), lambda i: (i, 0)),
        compiler_params=pltpu.CompilerParams(
            dimension_semantics=("parallel",)),                     # megacore sharding
    )(cls_feats, w1_folded, bias1, w2_pad, b2_pad)

    # Drop the zero-padded logit lanes; upcast the bf16 logits to f32.
    return out[:, :NUM_CLASSES].astype(jnp.float32)


def finetune_model_forward(input_ids, attention_mask, params):
    """Full FineTuneModel.forward (inference mode)."""
    # TODO(synk): the pretrained 'bert-base-uncased' transformer has no clean
    # in-script Pallas equivalent (pretrained checkpoint + 12-layer encoder);
    # a deterministic embedding lookup stands in for
    # bert(input_ids, attention_mask).last_hidden_state.
    last_hidden_state = params["embed_table"][input_ids]        # [B, S, 768]
    del attention_mask  # consumed by the (stand-in) backbone only

    # x = outputs.last_hidden_state[:, 0, :]
    # With the stand-in backbone XLA fuses this slice into the gather; with a
    # real Pallas backbone the head would read seq index 0 via its BlockSpec.
    cls = last_hidden_state[:, 0, :]                            # [B, 768] f32

    # self.dropout(x): Dropout(0.6) is identity in eval/inference mode.
    x = cls

    # fc1 -> batch_norm1 (folded) -> relu -> fc2  (fused Pallas kernel)
    return finetune_head(
        x,
        params["w1"], params["b1"],
        params["bn1_gamma"], params["bn1_beta"],
        params["bn1_mean"], params["bn1_var"],
        params["w2"], params["b2"],
    )


def make_params(key, vocab_size=32):
    ks = jax.random.split(key, 5)
    return {
        "embed_table": 0.02 * jax.random.normal(ks[0], (vocab_size, HIDDEN), jnp.float32),
        # Linear(768, 128): stored as [in, out]
        "w1": 0.02 * jax.random.normal(ks[1], (HIDDEN, FC1_OUT), jnp.float32),
        "b1": 0.01 * jax.random.normal(ks[2], (FC1_OUT,), jnp.float32),
        # BatchNorm1d(128) PyTorch defaults: gamma=1, beta=0, running mean=0, var=1
        "bn1_gamma": jnp.ones((FC1_OUT,), jnp.float32),
        "bn1_beta": jnp.zeros((FC1_OUT,), jnp.float32),
        "bn1_mean": jnp.zeros((FC1_OUT,), jnp.float32),
        "bn1_var": jnp.ones((FC1_OUT,), jnp.float32),
        # Linear(128, 2): stored as [in, out]
        "w2": 0.02 * jax.random.normal(ks[3], (FC1_OUT, NUM_CLASSES), jnp.float32),
        "b2": 0.01 * jax.random.normal(ks[4], (NUM_CLASSES,), jnp.float32),
        # NOTE: self.batch_norm2 exists in __init__ but is unused in forward.
    }


if __name__ == "__main__":
    key = jax.random.PRNGKey(0)
    k_ids, k_params = jax.random.split(key)

    B, S, VOCAB = 2, 8, 32
    input_ids = jax.random.randint(k_ids, (B, S), 0, VOCAB, dtype=jnp.int32)
    attention_mask = jnp.ones((B, S), dtype=jnp.int32)

    params = make_params(k_params, vocab_size=VOCAB)

    logits = finetune_model_forward(input_ids, attention_mask, params)
    logits = jax.block_until_ready(logits)

    # Pure-JAX f32 reference for the head (kernel uses bf16 matmul operands
    # and a bf16 output store, so the tolerance is loosened accordingly).
    cls = params["embed_table"][input_ids][:, 0, :]
    scale = params["bn1_gamma"] / jnp.sqrt(params["bn1_var"] + BN_EPS)
    shift = params["bn1_beta"] - params["bn1_mean"] * scale
    h = jnp.maximum((cls @ params["w1"] + params["b1"]) * scale + shift, 0.0)
    ref = h @ params["w2"] + params["b2"]

    assert logits.shape == (B, NUM_CLASSES)
    assert jnp.allclose(logits, ref, atol=2e-2, rtol=2e-2), (
        f"max abs err {jnp.max(jnp.abs(logits - ref))}")
    print("KERNEL_OK")
</pallas_src>

<mosaic_0001>
module attributes {stable_mosaic.version = 11 : i64} {
  func.func @head_kernel(%arg0: i32, %arg1: memref<2x768xf32, #tpu.memory_space<vmem>>, %arg2: memref<768x128xbf16, #tpu.memory_space<vmem>>, %arg3: memref<1x128xf32, #tpu.memory_space<vmem>>, %arg4: memref<128x128xbf16, #tpu.memory_space<vmem>>, %arg5: memref<1x128xf32, #tpu.memory_space<vmem>>, %arg6: memref<2x128xbf16, #tpu.memory_space<vmem>>) attributes {dimension_semantics = [#tpu.dimension_semantics<parallel>], iteration_bounds = array<i64: 1>, scalar_prefetch = 0 : i64, scratch_operands = 0 : i64, tpu.core_type = #tpu.core_type<tc>, window_params = [{transform_indices = @transform_0, window_bounds = array<i64: 2, 768>}, {pipeline_mode = #tpu.pipeline_mode<synchronous>, transform_indices = @transform_1, window_bounds = array<i64: 768, 128>}, {pipeline_mode = #tpu.pipeline_mode<synchronous>, transform_indices = @transform_2, window_bounds = array<i64: 1, 128>}, {pipeline_mode = #tpu.pipeline_mode<synchronous>, transform_indices = @transform_3, window_bounds = array<i64: 128, 128>}, {pipeline_mode = #tpu.pipeline_mode<synchronous>, transform_indices = @transform_4, window_bounds = array<i64: 1, 128>}, {transform_indices = @transform_5, window_bounds = array<i64: 2, 128>}]} {
    %c0 = arith.constant 0 : index
    %c0_0 = arith.constant 0 : index
    %0 = vector.load %arg1[%c0, %c0_0] : memref<2x768xf32, #tpu.memory_space<vmem>>, vector<2x768xf32>
    %1 = arith.truncf %0 : vector<2x768xf32> to vector<2x768xbf16>
    %c0_1 = arith.constant 0 : index
    %c0_2 = arith.constant 0 : index
    %2 = vector.load %arg2[%c0_1, %c0_2] : memref<768x128xbf16, #tpu.memory_space<vmem>>, vector<768x128xbf16>
    %cst = arith.constant dense<0.000000e+00> : vector<2x128xf32>
    %3 = tpu.matmul %1, %2, %cst {dimension_numbers = #tpu.dot_dimension_numbers<[1], [0], [0], [1], [0, 0, 1, 1], [], []>} : vector<2x768xbf16>, vector<768x128xbf16>, vector<2x128xf32> -> vector<2x128xf32>
    %c0_3 = arith.constant 0 : index
    %c0_4 = arith.constant 0 : index
    %4 = vector.load %arg3[%c0_3, %c0_4] : memref<1x128xf32, #tpu.memory_space<vmem>>, vector<1x128xf32>
    %5 = vector.broadcast %4 : vector<1x128xf32> to vector<2x128xf32>
    %6 = arith.addf %3, %5 : vector<2x128xf32>
    %cst_5 = arith.constant 0.000000e+00 : f32
    %7 = vector.broadcast %cst_5 : f32 to vector<2x128xf32>
    %8 = arith.maximumf %6, %7 : vector<2x128xf32>
    %9 = arith.truncf %8 : vector<2x128xf32> to vector<2x128xbf16>
    %c0_6 = arith.constant 0 : index
    %c0_7 = arith.constant 0 : index
    %10 = vector.load %arg4[%c0_6, %c0_7] : memref<128x128xbf16, #tpu.memory_space<vmem>>, vector<128x128xbf16>
    %cst_8 = arith.constant dense<0.000000e+00> : vector<2x128xf32>
    %11 = tpu.matmul %9, %10, %cst_8 {dimension_numbers = #tpu.dot_dimension_numbers<[1], [0], [0], [1], [0, 0, 1, 1], [], []>} : vector<2x128xbf16>, vector<128x128xbf16>, vector<2x128xf32> -> vector<2x128xf32>
    %c0_9 = arith.constant 0 : index
    %c0_10 = arith.constant 0 : index
    %12 = vector.load %arg5[%c0_9, %c0_10] : memref<1x128xf32, #tpu.memory_space<vmem>>, vector<1x128xf32>
    %13 = vector.broadcast %12 : vector<1x128xf32> to vector<2x128xf32>
    %14 = arith.addf %11, %13 : vector<2x128xf32>
    %15 = arith.truncf %14 : vector<2x128xf32> to vector<2x128xbf16>
    %c0_11 = arith.constant 0 : index
    %c0_12 = arith.constant 0 : index
    %16 = vector.load %arg6[%c0_11, %c0_12] : memref<2x128xbf16, #tpu.memory_space<vmem>>, vector<2x128xbf16>
    tpu.vector_store %arg6[%c0_11, %c0_12], %15 {strides = array<i32>} : memref<2x128xbf16, #tpu.memory_space<vmem>>, vector<2x128xbf16>,
    return
  }
  func.func @transform_0(%arg0: i32) -> (i32, i32) {
    %c0_i32 = arith.constant 0 : i32
    %c0_i32_0 = arith.constant 0 : i32
    return %arg0, %c0_i32 : i32, i32
  }
  func.func @transform_1(%arg0: i32) -> (i32, i32) {
    %c0_i32 = arith.constant 0 : i32
    %c0_i32_0 = arith.constant 0 : i32
    %c0_i32_1 = arith.constant 0 : i32
    return %c0_i32, %c0_i32_0 : i32, i32
  }
  func.func @transform_2(%arg0: i32) -> (i32, i32) {
    %c0_i32 = arith.constant 0 : i32
    %c0_i32_0 = arith.constant 0 : i32
    %c0_i32_1 = arith.constant 0 : i32
    return %c0_i32, %c0_i32_0 : i32, i32
  }
  func.func @transform_3(%arg0: i32) -> (i32, i32) {
    %c0_i32 = arith.constant 0 : i32
    %c0_i32_0 = arith.constant 0 : i32
    %c0_i32_1 = arith.constant 0 : i32
    return %c0_i32, %c0_i32_0 : i32, i32
  }
  func.func @transform_4(%arg0: i32) -> (i32, i32) {
    %c0_i32 = arith.constant 0 : i32
    %c0_i32_0 = arith.constant 0 : i32
    %c0_i32_1 = arith.constant 0 : i32
    return %c0_i32, %c0_i32_0 : i32, i32
  }
  func.func @transform_5(%arg0: i32) -> (i32, i32) {
    %c0_i32 = arith.constant 0 : i32
    %c0_i32_0 = arith.constant 0 : i32
    return %arg0, %c0_i32 : i32, i32
  }
}

</mosaic_0001>

<bundles_post_ra>
// kernel: tpu_custom_call.1
= control target key start
LH: loop header
LB: loop body
LE: loop exit
PB: predicated region body
PF: predicated region fallthrough
CT: control target
= control target key end

     0   :  { %10 = vsyncpa [#allocation3], 0  ;;  %s1104_s0 = inlined_call_operand.hbm [shape: f32[2,768], index: 0, kind: input, shape index: {}]   ;;  %s1105_s1 = inlined_call_operand.hbm [shape: bf16[768,128], index: 1, kind: input, shape index: {}]   ;;  %s1106_s2 = inlined_call_operand.vmem [shape: f32[1,128], index: 2, kind: input, shape index: {}]   ;;  %s1107_s3 = inlined_call_operand.hbm [shape: bf16[128,128], index: 3, kind: input, shape index: {}]   ;;  %s1108_s4 = inlined_call_operand.vmem [shape: f32[1,128], index: 4, kind: input, shape index: {}]   ;;  %s1109_s5 = inlined_call_operand.hbm [shape: bf16[2,128], index: 5, kind: output, shape index: {}]  }
   0x1   :  { %11 = vsyncpa [#allocation6], 0  ;;  %s28_s20 = sshll.u32 %s1105_s1, 4  ;;  %s29_s20 = int_to_ptr.hbm [resolvable:$true] %s28_s20 }
   0x2   :  { %12 = vsyncpa [#allocation4], 0  ;;  %s1050_s21 = smov [#allocation5]   ;;  %s18_s25 = sshll.u32 %s1104_s0, 4  ;;  %s19_s25 = int_to_ptr.hbm [resolvable:$true] %s18_s25 }
   0x3   :  { %s30_s22 = sshll.u32 %s1050_s21, 4  ;;  %s1051_s26 = smov 64   ;;  %s31_s22 = int_to_ptr.vmem [resolvable:$true] %s30_s22 }
   0x4   :  { %s1052_s27 = smov 4   ;;  %s1053_s28 = smov [#allocation2]  }
   0x5   :  { %36 = dma.hbm_to_vmem [thread:$0]  %s29_s20, 6144, %s31_s22, [#allocation6], %s1051_s26, %s1051_s26, %s1052_s27  }
   0x6   :  { %s20_s29 = sshll.u32 %s1053_s28, 4  ;;  %s43_s7 = sshll.u32 %s1107_s3, 4  ;;  %s21_s29 = int_to_ptr.vmem [resolvable:$true] %s20_s29  ;;  %s44_s7 = int_to_ptr.hbm [resolvable:$true] %s43_s7 }
   0x7   :  { %23 = dma.hbm_to_vmem [thread:$0]  %s19_s25, 192, %s21_s29, [#allocation3]  }
   0x8   :  { %s1054_s1 = smov [#allocation7]  }
   0x9   :  { %s45_s8 = sshll.u32 %s1054_s1, 4  ;;  %s46_s8 = int_to_ptr.vmem [resolvable:$true] %s45_s8 }
   0xa   :  { %51 = dma.hbm_to_vmem [thread:$0]  %s44_s7, 1024, %s46_s8, [#allocation6], %s1051_s26, %s1051_s26, %s1052_s27  }
   0xb   :  { %1044 = dma.done.wait [#allocation3], 192  }
   0xc   :  { %1045 = vsyncadd [#allocation3], 4294967104 }
   0xd   :  { %1046 = dma.done.wait [#allocation6], 7168  }
   0xe   :  { %1047 = vsyncadd [#allocation6], 4294960128  ;;  %v891_v0 = vld [vmem:[#allocation5 + $0x38] sm:$0xff]  ;;  %v890_v2 = vld [vmem:[#allocation5 + $0x30] sm:$0xff]  ;;  %s649_s14 = sshll.u32 %s1109_s5, 4  ;;  %s650_s14 = int_to_ptr.hbm [resolvable:$true] %s649_s14 }
   0xf   :  { %v899_v1 = vld [vmem:[#allocation5 + $0x78] sm:$0xff]  ;;  %479 = vmatpush.bf16.msra.mxu0 %v891_v0  ;;  %v898_v3 = vld [vmem:[#allocation5 + $0x70] sm:$0xff]  ;;  %v889_v8 = vld [vmem:[#allocation5 + $0x28] sm:$0xff] }
  0x10   :  { %492 = vmatpush.bf16.msra.mxu1 %v899_v1  ;;  %v907_v4 = vld [vmem:[#allocation5 + $0xb8] sm:$0xff]  ;;  %v906_v6 = vld [vmem:[#allocation5 + $0xb0] sm:$0xff]  ;;  %v897_v9 = vld [vmem:[#allocation5 + $0x68] sm:$0xff] }
  0x11   :  { %v915_v5 = vld [vmem:[#allocation5 + $0xf8] sm:$0xff]  ;;  %505 = vmatpush.bf16.msra.mxu2 %v907_v4  ;;  %v914_v7 = vld [vmem:[#allocation5 + $0xf0] sm:$0xff]  ;;  %v905_v10 = vld [vmem:[#allocation5 + $0xa8] sm:$0xff] }
  0x12   :  { %518 = vmatpush.bf16.msra.mxu3 %v915_v5  ;;  %v913_v11 = vld [vmem:[#allocation5 + $0xe8] sm:$0xff]  ;;  %v888_v12 = vld [vmem:[#allocation5 + $0x20] sm:$0xff]  ;;  %v66_v14 = vld [vmem:[#allocation2] sm:$0xff] }
  0x13   :  { %480 = vmatpush.bf16.msra.mxu0 %v890_v2  ;;  %v896_v13 = vld [vmem:[#allocation5 + $0x60] sm:$0xff]  ;;  %70 = vst [vmem:[#allocation1] ss:$4 sm:$0xff] %v66_v14  ;;  %v887_v16 = vld [vmem:[#allocation5 + $0x18] sm:$0xff]  ;;  %v886_v21 = vld [vmem:[#allocation5 + $0x10] sm:$0xff] }
  0x14   :  { %493 = vmatpush.bf16.msra.mxu1 %v898_v3  ;;  %v904_v15 = vld [vmem:[#allocation5 + $0xa0] sm:$0xff]  ;;  %v895_v18 = vld [vmem:[#allocation5 + $0x58] sm:$0xff]  ;;  %v894_v22 = vld [vmem:[#allocation5 + $0x50] sm:$0xff] }
  0x15   :  { %506 = vmatpush.bf16.msra.mxu2 %v906_v6  ;;  %v912_v17 = vld [vmem:[#allocation5 + $0xe0] sm:$0xff]  ;;  %v903_v19 = vld [vmem:[#allocation5 + $0x98] sm:$0xff]  ;;  %v902_v23 = vld [vmem:[#allocation5 + $0x90] sm:$0xff] }
  0x16   :  { %519 = vmatpush.bf16.msra.mxu3 %v914_v7  ;;  %v911_v20 = vld [vmem:[#allocation5 + $0xd8] sm:$0xff]  ;;  %v910_v24 = vld [vmem:[#allocation5 + $0xd0] sm:$0xff]  ;;  %v885_v26 = vld [vmem:[#allocation5 + $0x8] sm:$0xff] }
  0x17   :  { %481 = vmatpush.bf16.msra.mxu0 %v889_v8  ;;  %v67_v25 = vld [vmem:[#allocation2 + $0x8] sm:$0xf]  ;;  %v893_v27 = vld [vmem:[#allocation5 + $0x48] sm:$0xff]  ;;  %v884_v29 = vld [vmem:[#allocation5] sm:$0xff] }
  0x18   :  { %494 = vmatpush.bf16.msra.mxu1 %v897_v9  ;;  %72 = vst [vmem:[#allocation1 + $0x20] ss:$4 sm:$0xff] %v67_v25  ;;  %v901_v28 = vld [vmem:[#allocation5 + $0x88] sm:$0xff]  ;;  %v892_v30 = vld [vmem:[#allocation5 + $0x40] sm:$0xff]  ;;  %v923_v34 = vld [vmem:[#allocation5 + $0x138] sm:$0xff] }
  0x19   :  { %507 = vmatpush.bf16.msra.mxu2 %v905_v10  ;;  %v909_v31 = vld [vmem:[#allocation5 + $0xc8] sm:$0xff]  ;;  %v931_v35 = vld [vmem:[#allocation5 + $0x178] sm:$0xff]  ;;  %v900_v36 = vld [vmem:[#allocation5 + $0x80] sm:$0xff] }
  0x1a   :  { %520 = vmatpush.bf16.msra.mxu3 %v913_v11  ;;  %v73_v32 = vld.sshfl [vmem:[#allocation1] sm:$0xff pattern:$0x73625140]  ;;  %v74_v33 = vld.sshfl [vmem:[#allocation1 + $0x8] sm:$0xff pattern:$0x73625140] }
  0x1b   :  { %482 = vmatpush.bf16.msra.mxu0 %v888_v12  ;;  %v85_v37 = vpack.c.bf16 %v73_v32, %v73_v32  ;;  %v86_v38 = vpack.c.bf16 %v74_v33, %v74_v33  ;;  %v75_v39 = vld.sshfl [vmem:[#allocation1 + $0x10] sm:$0xff pattern:$0x73625140]  ;;  %v76_v41 = vld.sshfl [vmem:[#allocation1 + $0x18] sm:$0xff pattern:$0x73625140] }
  0x1c   :  { %495 = vmatpush.bf16.msra.mxu1 %v896_v13  ;;  %v908_v40 = vld [vmem:[#allocation5 + $0xc0] sm:$0xff]  ;;  %v922_v42 = vld [vmem:[#allocation5 + $0x130] sm:$0xff]  ;;  %v87_v44 = vpack.c.bf16 %v75_v39, %v75_v39  ;;  %v88_v45 = vpack.c.bf16 %v76_v41, %v76_v41  ;;  %v921_v46 = vld [vmem:[#allocation5 + $0x128] sm:$0xff] }
  0x1d   :  { %508 = vmatpush.bf16.msra.mxu2 %v904_v15  ;;  %v930_v43 = vld [vmem:[#allocation5 + $0x170] sm:$0xff]  ;;  %v929_v47 = vld [vmem:[#allocation5 + $0x168] sm:$0xff]  ;;  %v920_v48 = vld [vmem:[#allocation5 + $0x120] sm:$0xff] }
  0x1e   :  { %521 = vmatpush.bf16.msra.mxu3 %v912_v17  ;;  %v928_v49 = vld [vmem:[#allocation5 + $0x160] sm:$0xff]  ;;  %v919_v50 = vld [vmem:[#allocation5 + $0x118] sm:$0xff]  ;;  %v918_v52 = vld [vmem:[#allocation5 + $0x110] sm:$0xff] }
  0x1f   :  { %483 = vmatpush.bf16.msra.mxu0 %v887_v16  ;;  %v927_v51 = vld [vmem:[#allocation5 + $0x158] sm:$0xff]  ;;  %v926_v53 = vld [vmem:[#allocation5 + $0x150] sm:$0xff]  ;;  %v917_v54 = vld [vmem:[#allocation5 + $0x108] sm:$0xff] }
  0x20   :  { %496 = vmatpush.bf16.msra.mxu1 %v895_v18  ;;  %v925_v55 = vld [vmem:[#allocation5 + $0x148] sm:$0xff]  ;;  %v916_v56 = vld [vmem:[#allocation5 + $0x100] sm:$0xff]  ;;  %v78_v59 = vld.sshfl [vmem:[#allocation1 + $0x28] sm:$0xff pattern:$0x73625140] }
  0x21   :  { %509 = vmatpush.bf16.msra.mxu2 %v903_v19  ;;  %v924_v57 = vld [vmem:[#allocation5 + $0x140] sm:$0xff]  ;;  %v77_v58 = vld.sshfl [vmem:[#allocation1 + $0x20] sm:$0xff pattern:$0x73625140]  ;;  %v90_v61 = vpack.c.bf16 %v78_v59, %v78_v59  ;;  %v939_v62 = vld [vmem:[#allocation7 + $0x38] sm:$0xff] }
  0x22   :  { %522 = vmatpush.bf16.msra.mxu3 %v911_v20  ;;  %v89_v60 = vpack.c.bf16 %v77_v58, %v77_v58  ;;  %v938_v63 = vld [vmem:[#allocation7 + $0x30] sm:$0xff]  ;;  %v937_v0 = vld [vmem:[#allocation7 + $0x28] sm:$0xff]  ;;  %v936_v1 = vld [vmem:[#allocation7 + $0x20] sm:$0xff] }
  0x23   :  { %484 = vmatpush.bf16.msra.mxu0 %v886_v21  ;;  %v935_v2 = vld [vmem:[#allocation7 + $0x18] sm:$0xff]  ;;  %v934_v3 = vld [vmem:[#allocation7 + $0x10] sm:$0xff]  ;;  %v933_v4 = vld [vmem:[#allocation7 + $0x8] sm:$0xff] }
  0x24   :  { %497 = vmatpush.bf16.msra.mxu1 %v894_v22  ;;  %v932_v7 = vld [vmem:[#allocation7] sm:$0xff]  ;;  %v946_v12 = vld [vmem:[%s1106_s2] ss:$0 sm:$0xff]  ;;  %s1055_s2 = smov [#allocation8]  }
  0x25   :  { %510 = vmatpush.bf16.msra.mxu2 %v902_v23  ;;  %s647_s11 = sshll.u32 %s1055_s2, 4  ;;  %s648_s11 = int_to_ptr.vmem [resolvable:$true] %s647_s11 }
  0x26   :  { %523 = vmatpush.bf16.msra.mxu3 %v910_v24 }
  0x27   :  { %485 = vmatpush.bf16.msra.mxu0 %v885_v26 }
  0x28   :  { %498 = vmatpush.bf16.msra.mxu1 %v893_v27  ;;  %v947_v27 = vld [vmem:[%s1108_s4] ss:$0 sm:$0xff] }
  0x29   :  { %511 = vmatpush.bf16.msra.mxu2 %v901_v28 }
  0x2a   :  { %524 = vmatpush.bf16.msra.mxu3 %v909_v31 }
  0x2b   :  { %486 = vmatpush.bf16.msra.mxu0 %v884_v29 }
  0x2c   :  { %499 = vmatpush.bf16.msra.mxu1 %v892_v30 }
  0x2d   :  { %512 = vmatpush.bf16.msra.mxu2 %v900_v36 }
  0x2e   :  { %487 = vmatmul.bf16.vlgmr.msra.gmra.mxu0 %v85_v37  ;;  %525 = vmatpush.bf16.msra.mxu3 %v908_v40 }
  0x2f   :  { %531 = vmatpush.bf16.msrb.mxu0 %v923_v34  ;;  %500 = vmatmul.bf16.vlgmr.msra.gmra.mxu1 %v86_v38 }
  0x30   :  { %544 = vmatpush.bf16.msrb.mxu1 %v931_v35  ;;  %513 = vmatmul.bf16.vlgmr.msra.gmra.mxu2 %v87_v44 }
  0x31   :  { %526 = vmatmul.bf16.vlgmr.msra.gmra.mxu3 %v88_v45  ;;  %627 = vmatpush.bf16.msrb.mxu2 %v939_v62 }
  0x33   :  { %532 = vmatpush.bf16.msrb.mxu0 %v922_v42 }
  0x34   :  { %545 = vmatpush.bf16.msrb.mxu1 %v930_v43 }
  0x35   :  { %628 = vmatpush.bf16.msrb.mxu2 %v938_v63 }
  0x37   :  { %533 = vmatpush.bf16.msrb.mxu0 %v921_v46 }
  0x38   :  { %546 = vmatpush.bf16.msrb.mxu1 %v929_v47 }
  0x39   :  { %629 = vmatpush.bf16.msrb.mxu2 %v937_v0 }
  0x3b   :  { %534 = vmatpush.bf16.msrb.mxu0 %v920_v48 }
  0x3c   :  { %547 = vmatpush.bf16.msrb.mxu1 %v928_v49 }
  0x3d   :  { %630 = vmatpush.bf16.msrb.mxu2 %v936_v1 }
  0x3f   :  { %535 = vmatpush.bf16.msrb.mxu0 %v919_v50 }
  0x40   :  { %548 = vmatpush.bf16.msrb.mxu1 %v927_v51 }
  0x41   :  { %631 = vmatpush.bf16.msrb.mxu2 %v935_v2 }
  0x43   :  { %536 = vmatpush.bf16.msrb.mxu0 %v918_v52 }
  0x44   :  { %549 = vmatpush.bf16.msrb.mxu1 %v926_v53 }
  0x45   :  { %632 = vmatpush.bf16.msrb.mxu2 %v934_v3 }
  0x47   :  { %537 = vmatpush.bf16.msrb.mxu0 %v917_v54 }
  0x48   :  { %550 = vmatpush.bf16.msrb.mxu1 %v925_v55 }
  0x49   :  { %633 = vmatpush.bf16.msrb.mxu2 %v933_v4 }
  0x4b   :  { %538 = vmatpush.bf16.msrb.mxu0 %v916_v56 }
  0x4c   :  { %551 = vmatpush.bf16.msrb.mxu1 %v924_v57 }
  0x4d   :  { %634 = vmatpush.bf16.msrb.mxu2 %v932_v7 }
  0x4e   :  { %539 = vmatmul.bf16.vlgmr.msrb.gmra.mxu0 %v89_v60 }
  0x4f   :  { %552 = vmatmul.bf16.vlgmr.msrb.gmra.mxu1 %v90_v61 }
  0xab   :  { %v488_v5 = vpop.f32.mrf.mxu0 }
  0xac   :  { %v501_v6 = vpop.f32.mrf.mxu1  ;;  %v489_v13 = vadd.f32 %v946_v12, %v488_v5 }
  0xae   :  { %v502_v16 = vadd.f32 %v501_v6, %v489_v13 }
  0xb3   :  { %v490_v8 = vpop.f32.mrf.mxu0  ;;  %v514_v10 = vpop.f32.mrf.mxu2 }
  0xb4   :  { %v503_v9 = vpop.f32.mrf.mxu1  ;;  %v527_v11 = vpop.f32.mrf.mxu3  ;;  %v515_v17 = vadd.f32 %v514_v10, %v502_v16 }
  0xb6   :  { %v528_v18 = vadd.f32 %v527_v11, %v515_v17 }
  0xbb   :  { %v516_v14 = vpop.f32.mrf.mxu2 }
  0xbc   :  { %v529_v15 = vpop.f32.mrf.mxu3 }
  0xcb   :  { %v540_v19 = vpop.f32.mrf.mxu0 }
  0xcc   :  { %v553_v20 = vpop.f32.mrf.mxu1  ;;  %v541_v21 = vadd.f32 %v540_v19, %v528_v18 }
  0xce   :  { %v554_v22 = vadd.f32 %v553_v20, %v541_v21 }
  0xd0   :  { %v557_v23 = vmax.f32 %v554_v22, 0.0 }
  0xd2   :  { %v558_v24 = vpack.c.bf16 %v557_v23, %v557_v23 }
  0xd3   :  { %v542_v25 = vpop.f32.mrf.mxu0 }
  0xd4   :  { %v555_v26 = vpop.f32.mrf.mxu1  ;;  %635 = vmatmul.bf16.vlgmr.msrb.gmra.mxu2 %v558_v24 }
 0x157   :  { %v636_v28 = vpop.f32.mrf.mxu2 }
 0x158   :  { %v637_v29 = vadd.f32 %v947_v27, %v636_v28 }
 0x15a   :  { %v640_v30 = vpack.c.bf16 %v637_v29, %v637_v29 }
 0x15c   :  { %641 = vst [vmem:[#allocation8] sm:$0x1] %v640_v30 }
 0x15d   :  { %652 = dma.vmem_to_hbm [thread:$0]  %s648_s11, 16, %s650_s14, [#allocation4]  }
 0x15f   :  { %v638_v31 = vpop.f32.mrf.mxu2 }
 0x160   :  { %1048 = dma.done.wait [#allocation4], 16  }
 0x161   :  { %1049 = vsyncadd [#allocation4], 4294967280 }
 0x162   :  { %657 = vsyncpa [#allocation3], 1 }
 0x163   :  { %658 = vsyncpa [#allocation6], 1 }
 0x164   :  { %659 = vsyncpa [#allocation4], 1 }

</bundles_post_ra>
